<compile_context>
chip_gen: v7x
topology: tpu7x:2x2x1
jax: 0.10.0
libtpu: 0.0.40
codegen_flags: <defaults>
</compile_context>

<pallas_src>
import functools

import numpy as np
import jax
import jax.numpy as jnp
from jax.experimental import pallas as pl
from jax.experimental.pallas import tpu as pltpu

LARGE_NUMBER = 1.0e9
TAU = 1.0
MULTIPLIER = 2          # module default
NORM = 1.0
EPS = 1e-12             # F.normalize eps
_LANES = 128


def _round_up(x, m):
    return (x + m - 1) // m * m


def _tiles_for(n, d, cb):
    """Row/col tiles + row padding for the similarity kernel.

    TN is made as large as a conservative VMEM working-set budget allows so
    that for small/medium N the whole column operand is one resident block
    (grid_j == 1, DMA'd once).  Budget derived for v7x (64 MiB VMEM per TC,
    40 MiB limit set by the caller); v5e/v6e (128 MiB) are strictly easier.
    """
    tm = min(256, _round_up(n, 128))
    n_pad = _round_up(n, tm)
    budget = 30 * 1024 * 1024
    # zr + zp blocks (double-buffered) + two lane-dense f32 outputs
    # (double-buffered) + scratch slack.
    fixed = 2 * 2 * tm * d * cb + 2 * 2 * tm * _LANES * 4 + 64 * 1024
    # Per column of TN: double-buffered zc block + ~2 live (TM, TN) f32
    # temporaries (the similarity tile and its exp / masked copy).
    per_col = 2 * d * cb + 2 * tm * 4
    tn_cap = max(256, (budget - fixed) // per_col // 256 * 256)
    tn = n_pad if n_pad <= tn_cap else tn_cap
    return tm, tn, n_pad


def _norm_rows_for(n_pad, d, cb):
    """Kernel-1 row tile.  The normalize pass is purely HBM-bound, so use a
    much larger tile than kernel 2's TM (small tiles pay ~0.35us/step of
    pipeline overhead and reach <30% of the HBM roofline)."""
    budget = 24 * 1024 * 1024
    for cand in (8192, 4096, 2048, 1024, 512, 256, 128):
        if cand <= n_pad and n_pad % cand == 0 and 2 * cand * d * (4 + cb) <= budget:
            return cand
    return 128   # n_pad is always a multiple of 128


def _normalize_kernel(z_ref, zn_ref, *, inv_sqrt_tau):
    z = z_ref[...].astype(jnp.float32)                               # (tm1, d)
    # rsqrt goes to the EUP; fold 1/sqrt(tau) into the same per-row scale.
    # (Reference uses z / max(||z||, eps); identical for non-degenerate rows.)
    inv = jax.lax.rsqrt(jnp.sum(z * z, axis=1, keepdims=True) + EPS * EPS)
    zn_ref[...] = (z * (inv * inv_sqrt_tau)).astype(zn_ref.dtype)


def _ntxent_kernel(zr_ref, zc_ref, zp_ref, loss_ref, acc_ref,
                   m_sc, l_sc, pos_sc, *, n, tn, shift, acc_tol):
    i = pl.program_id(0)          # row-tile index  ("parallel")
    j = pl.program_id(1)          # col-tile index  (softmax reduction, last)
    tm = zr_ref.shape[0]
    row_start = i * tm
    col_start = j * tn

    @pl.when(j == 0)
    def _init():
        m_sc[...] = jnp.full(m_sc.shape, -jnp.inf, jnp.float32)
        l_sc[...] = jnp.zeros(l_sc.shape, jnp.float32)
        # Positive-pair logit: once per row tile (O(N*D) total), not per
        # (TM,TN) element.  zp holds zn[(r + n/2) % n] for row r.
        pos_sc[...] = jnp.sum(zr_ref[...].astype(jnp.float32)
                              * zp_ref[...].astype(jnp.float32),
                              axis=1, keepdims=True)

    # Similarity tile: contract on the feature dim of both operands (no
    # materialized transpose).  bf16 feed (default), f32 accumulation.
    s = jax.lax.dot_general(zr_ref[...], zc_ref[...],
                            dimension_numbers=(((1,), (1,)), ((), ())),
                            preferred_element_type=jnp.float32)      # (tm, tn)

    # Gate the diagonal / padding mask to the tiles that actually need it.
    has_diag = jnp.logical_and(col_start < row_start + tm,
                               row_start < col_start + tn)
    has_tail = col_start + tn > n       # padded / ragged columns in this tile
    needs_mask = jnp.logical_or(has_diag, has_tail)

    # Fixed softmax shift: rows are unit-norm * 1/sqrt(tau) => s <= 1/tau.
    @pl.when(needs_mask)
    def _update_masked():
        col = jax.lax.broadcasted_iota(jnp.int32, s.shape, 1) + col_start
        row = jax.lax.broadcasted_iota(jnp.int32, (tm, 1), 0) + row_start
        sm = jnp.where(jnp.logical_or(col == row, col >= n), -LARGE_NUMBER, s)
        m_sc[...] = jnp.maximum(m_sc[...], jnp.max(sm, axis=1, keepdims=True))
        l_sc[...] += jnp.sum(jnp.exp(sm - shift), axis=1, keepdims=True)

    @pl.when(jnp.logical_not(needs_mask))
    def _update_plain():
        m_sc[...] = jnp.maximum(m_sc[...], jnp.max(s, axis=1, keepdims=True))
        l_sc[...] += jnp.sum(jnp.exp(s - shift), axis=1, keepdims=True)

    @pl.when(j == pl.num_programs(1) - 1)
    def _finalize():
        row = jax.lax.broadcasted_iota(jnp.int32, (tm, 1), 0) + row_start
        valid = row < n                                              # (tm, 1)
        pos = pos_sc[...]
        # -logprob[r, label[r]] = (shift + log sum exp(s - shift)) - pos
        row_loss = jnp.where(valid, shift + jnp.log(l_sc[...]) - pos, 0.0)
        # Top-1 accuracy: positive column attains the row max of the masked
        # logits.  acc_tol absorbs the MXU-vs-VPU accumulation-order rounding
        # between pos and the same entry inside s (ties change only at exact
        # float-tie resolution).
        row_acc = jnp.where(jnp.logical_and(valid, pos >= m_sc[...] - acc_tol),
                            1.0, 0.0)
        # Lane-dense stores: broadcast per-row scalars across the 128 lanes.
        loss_ref[...] = jnp.broadcast_to(row_loss, loss_ref.shape)
        acc_ref[...] = jnp.broadcast_to(row_acc, acc_ref.shape)


def ntxent_pallas(z, *, tau=TAU, multiplier=MULTIPLIER,
                  compute_dtype=jnp.bfloat16):
    """z: (n, d).  Returns (loss scalar f32, acc (n,) f32)."""
    assert multiplier == 2, "only multiplier=2 is implemented"
    n, d = z.shape
    assert n % multiplier == 0

    cb = jnp.dtype(compute_dtype).itemsize
    d_pad = _round_up(d, _LANES)                 # lane-aligned feature dim
    tm, tn, n_pad = _tiles_for(n, d_pad, cb)
    z_p = jnp.pad(z.astype(jnp.float32), ((0, n_pad - n), (0, d_pad - d)))

    # --- kernel 1: row-wise L2 normalize scaled by 1/sqrt(tau) -------------
    tm1 = _norm_rows_for(n_pad, d_pad, cb)
    zn = pl.pallas_call(
        functools.partial(_normalize_kernel,
                          inv_sqrt_tau=float(1.0 / np.sqrt(tau))),
        out_shape=jax.ShapeDtypeStruct((n_pad, d_pad), compute_dtype),
        grid=(n_pad // tm1,),
        in_specs=[pl.BlockSpec((tm1, d_pad), lambda i: (i, 0))],
        out_specs=pl.BlockSpec((tm1, d_pad), lambda i: (i, 0)),
        compiler_params=pltpu.CompilerParams(
            dimension_semantics=("parallel",)),
    )(z_p)

    # Partner rows for multiplier=2 (label[r] = (r + n/2) % n): tiny O(N*D)
    # shuffle so kernel 2 reduces the positive logit once per row tile.
    half = n // 2
    zp = jnp.pad(jnp.roll(zn[:n], -half, axis=0), ((0, n_pad - n), (0, 0)))

    # --- kernel 2: tiled similarity + fixed-shift softmax + loss / top-1 ---
    grid = (n_pad // tm, pl.cdiv(n_pad, tn))
    rowloss, rowacc = pl.pallas_call(
        functools.partial(_ntxent_kernel, n=n, tn=tn,
                          shift=float(1.0 / tau),
                          acc_tol=float(1e-5 / tau)),
        out_shape=(jax.ShapeDtypeStruct((n_pad, _LANES), jnp.float32),
                   jax.ShapeDtypeStruct((n_pad, _LANES), jnp.float32)),
        grid_spec=pltpu.PrefetchScalarGridSpec(
            num_scalar_prefetch=0,
            grid=grid,
            in_specs=[pl.BlockSpec((tm, d_pad), lambda i, j: (i, 0)),   # rows
                      pl.BlockSpec((tn, d_pad), lambda i, j: (j, 0)),   # cols
                      pl.BlockSpec((tm, d_pad), lambda i, j: (i, 0))],  # partners
            out_specs=[pl.BlockSpec((tm, _LANES), lambda i, j: (i, 0)),
                       pl.BlockSpec((tm, _LANES), lambda i, j: (i, 0))],
            scratch_shapes=[pltpu.VMEM((tm, 1), jnp.float32),   # running max
                            pltpu.VMEM((tm, 1), jnp.float32),   # sum exp(s-c)
                            pltpu.VMEM((tm, 1), jnp.float32)],  # positive logit
        ),
        compiler_params=pltpu.CompilerParams(
            dimension_semantics=("parallel", "arbitrary"),
            # Re-derived for v7x's 64 MiB VMEM/TC: the tile budget in
            # _tiles_for keeps the working set <= ~30 MiB, so 40 MiB leaves
            # headroom (v5e/v6e have 128 MiB and are unaffected).
            vmem_limit_bytes=40 * 1024 * 1024),
    )(zn, zn, zp)

    # Tiny O(N) epilogue (padded rows contribute exact zeros).
    loss = jnp.sum(rowloss[:, 0]) / n / (multiplier - 1) / NORM
    return loss, rowacc[:n, 0]


def ntxent_ref(z, tau=TAU, multiplier=MULTIPLIER):
    """Pure-JAX reference mirroring the PyTorch forward (m=2, no DDP)."""
    n, _ = z.shape
    m = multiplier
    zn = z / jnp.maximum(jnp.linalg.norm(z, axis=1, keepdims=True), EPS)
    zn = zn / np.sqrt(tau)
    logits = zn @ zn.T
    idx = jnp.arange(n)
    logits = logits.at[idx, idx].set(-LARGE_NUMBER)
    logprob = jax.nn.log_softmax(logits, axis=1)
    labels = (np.repeat(np.arange(n), m) + np.tile(np.arange(m) * n // m, n)) % n
    labels = labels.reshape(n, m)[:, 1:].reshape(-1)
    loss = -logprob[np.repeat(np.arange(n), m - 1), labels].sum() / n / (m - 1) / NORM
    pred = logprob.at[idx, idx].set(-LARGE_NUMBER)
    top1 = jnp.argmax(pred, axis=1)
    acc = (top1 == jnp.asarray(labels.reshape(n, m - 1))[:, 0]).astype(jnp.float32)
    return loss, acc


if __name__ == "__main__":
    key = jax.random.PRNGKey(0)
    n, d = 8, 32                        # n % multiplier == 0 (small test shape)
    z = jax.random.normal(key, (n, d), dtype=jnp.float32)

    loss_want, acc_want = ntxent_ref(z)

    # Exact-semantics path (f32 MXU feed): tight check vs the reference.
    loss32, acc32 = ntxent_pallas(z, compute_dtype=jnp.float32)
    jax.block_until_ready((loss32, acc32))
    np.testing.assert_allclose(np.asarray(loss32), np.asarray(loss_want),
                               rtol=1e-4, atol=1e-4)
    np.testing.assert_array_equal(np.asarray(acc32), np.asarray(acc_want))

    # Default fast path (bf16 MXU feed, f32 accumulation): loose loss check.
    # (Top-1 ties can shift at bf16 resolution, so acc is not bit-compared.)
    loss16, acc16 = ntxent_pallas(z)
    jax.block_until_ready((loss16, acc16))
    np.testing.assert_allclose(np.asarray(loss16), np.asarray(loss_want),
                               rtol=0, atol=3e-2)

    print("KERNEL_OK")
</pallas_src>

<mosaic_0001>
module attributes {stable_mosaic.version = 11 : i64} {
  func.func @_normalize_kernel(%arg0: i32, %arg1: memref<128x128xf32, #tpu.memory_space<vmem>>, %arg2: memref<128x128xf32, #tpu.memory_space<vmem>>) attributes {dimension_semantics = [#tpu.dimension_semantics<parallel>], iteration_bounds = array<i64: 1>, scalar_prefetch = 0 : i64, scratch_operands = 0 : i64, tpu.core_type = #tpu.core_type<tc>, window_params = [{transform_indices = @transform_0, window_bounds = array<i64: 128, 128>}, {transform_indices = @transform_1, window_bounds = array<i64: 128, 128>}]} {
    %c0 = arith.constant 0 : index
    %c0_0 = arith.constant 0 : index
    %0 = vector.load %arg1[%c0, %c0_0] : memref<128x128xf32, #tpu.memory_space<vmem>>, vector<128x128xf32>
    %1 = arith.mulf %0, %0 : vector<128x128xf32>
    %cst = arith.constant dense<0.000000e+00> : vector<128xf32>
    %2 = vector.multi_reduction <add>, %1, %cst [1] : vector<128x128xf32> to vector<128xf32>
    %3 = vector.shape_cast %2 : vector<128xf32> to vector<128x1xf32>
    %cst_1 = arith.constant 1.000000e-24 : f32
    %4 = vector.broadcast %cst_1 : f32 to vector<128x1xf32>
    %5 = arith.addf %3, %4 : vector<128x1xf32>
    %6 = math.rsqrt %5 : vector<128x1xf32>
    %cst_2 = arith.constant 1.000000e+00 : f32
    %7 = vector.broadcast %cst_2 : f32 to vector<128x1xf32>
    %8 = arith.mulf %6, %7 : vector<128x1xf32>
    %9 = vector.broadcast %8 : vector<128x1xf32> to vector<128x128xf32>
    %10 = arith.mulf %0, %9 : vector<128x128xf32>
    %c0_3 = arith.constant 0 : index
    %c0_4 = arith.constant 0 : index
    %11 = vector.load %arg2[%c0_3, %c0_4] : memref<128x128xf32, #tpu.memory_space<vmem>>, vector<128x128xf32>
    tpu.vector_store %arg2[%c0_3, %c0_4], %10 {strides = array<i32>} : memref<128x128xf32, #tpu.memory_space<vmem>>, vector<128x128xf32>,
    return
  }
  func.func @transform_0(%arg0: i32) -> (i32, i32) {
    %c0_i32 = arith.constant 0 : i32
    %c0_i32_0 = arith.constant 0 : i32
    return %arg0, %c0_i32 : i32, i32
  }
  func.func @transform_1(%arg0: i32) -> (i32, i32) {
    %c0_i32 = arith.constant 0 : i32
    %c0_i32_0 = arith.constant 0 : i32
    return %arg0, %c0_i32 : i32, i32
  }
}

</mosaic_0001>

<bundles_post_ra>
// kernel: tpu_custom_call.1
= control target key start
LH: loop header
LB: loop body
LE: loop exit
PB: predicated region body
PF: predicated region fallthrough
CT: control target
= control target key end

     0   :  { %6 = vsyncpa [#allocation3], 0  ;;  %s376_s0 = inlined_call_operand.hbm [shape: f32[128,128], index: 0, kind: input, shape index: {}]   ;;  %s377_s1 = inlined_call_operand.hbm [shape: f32[128,128], index: 1, kind: output, shape index: {}]  }
   0x1   :  { %7 = vsyncpa [#allocation4], 0  ;;  %s252_s6 = smov [#allocation2]   ;;  %s204_s10 = scalar_lea.hbm %s376_s0, 2048 }
   0x2   :  { %s13_s7 = sshll.u32 %s252_s6, 4  ;;  %p205_p0 = scmp.ne.s32.totalorder %s376_s0, %s204_s10  ;;  %s14_s7 = int_to_ptr.vmem [resolvable:$true] %s13_s7 }
   0x3   :  { %p208_p1 = scmp.lt.u32.totalorder %s204_s10, %s376_s0 }
   0x5   :  { %p210_p2 = pnand %p208_p1, %p205_p0 }
   0x7   :  { %213 = shalt.err (!%p210_p2)
}
   0x8   :  { %s214_s15 = scalar_lea.vmem %s14_s7, 2048  ;;  %p219_p4 = scmp.lt.s32.totalorder %s14_s7, %s14_s7 }
   0x9   :  { %p215_p3 = scmp.ne.s32.totalorder %s14_s7, %s214_s15  ;;  %p220_p5 = scmp.lt.s32.totalorder %s214_s15, %s214_s15 }
   0xb   :  { %p221_p6 = por %p220_p5, %p219_p4 }
   0xd   :  { %p222_p7 = pnand %p221_p6, %p215_p3 }
   0xf   :  { %225 = shalt.err (!%p222_p7)
}
  0x10   :  { %s253_s16 = smov 128   ;;  %s254_s17 = smov 8  }
  0x11   :  { %19 = dma.hbm_to_vmem [thread:$0]  %s376_s0, 2048, %s14_s7, [#allocation3], %s253_s16, %s253_s16, %s254_s17  }
  0x12   :  { %248 = dma.done.wait [#allocation3], 2048  }
  0x13   :  { %249 = vsyncadd [#allocation3], 4294965248  ;;  %v281_v0 = vld [vmem:[#allocation2 + $0x10] sm:$0xff]  ;;  %v283_v1 = vld [vmem:[#allocation2] sm:$0xff]  ;;  %s255_s0 = smov [#allocation5]  }
  0x14   :  { %v285_v2 = vld [vmem:[#allocation2 + $0x18] sm:$0xff]  ;;  %v41_v3 = vmul.f32 %v281_v0, %v281_v0  ;;  %v39_v4 = vmul.f32 %v283_v1, %v283_v1  ;;  %v291_v5 = vld [vmem:[#allocation2 + $0x8] sm:$0xff]  ;;  %v299_v9 = vld [vmem:[#allocation2 + $0x20] sm:$0xff]  ;;  %s156_s20 = sshll.u32 %s255_s0, 4  ;;  %s157_s20 = int_to_ptr.vmem [resolvable:$true] %s156_s20 }
  0x15   :  { %v42_v6 = vmul.f32 %v285_v2, %v285_v2  ;;  %v40_v7 = vmul.f32 %v291_v5, %v291_v5  ;;  %v297_v8 = vld [vmem:[#allocation2 + $0x28] sm:$0xff]  ;;  %v43_v11 = vmul.f32 %v299_v9, %v299_v9  ;;  %v305_v12 = vld [vmem:[#allocation2 + $0x38] sm:$0xff]  ;;  %v307_v13 = vld [vmem:[#allocation2 + $0x30] sm:$0xff]  ;;  %s226_s21 = scalar_lea.vmem %s157_s20, 2048  ;;  %p231_p9 = scmp.lt.s32.totalorder %s157_s20, %s157_s20 }
  0x16   :  { %59 = vadd.xlane.f32.xlu1 %v41_v3  ;;  %55 = vadd.xlane.f32.xlu0 %v39_v4  ;;  %v44_v10 = vmul.f32 %v297_v8, %v297_v8  ;;  %v46_v14 = vmul.f32 %v305_v12, %v305_v12  ;;  %v45_v15 = vmul.f32 %v307_v13, %v307_v13  ;;  %v313_v16 = vld [vmem:[#allocation2 + $0x48] sm:$0xff]  ;;  %v315_v17 = vld [vmem:[#allocation2 + $0x40] sm:$0xff]  ;;  %v321_v20 = vld [vmem:[#allocation2 + $0x58] sm:$0xff]  ;;  %p227_p8 = scmp.ne.s32.totalorder %s157_s20, %s226_s21  ;;  %p232_p10 = scmp.lt.s32.totalorder %s226_s21, %s226_s21 }
  0x17   :  { %v48_v18 = vmul.f32 %v313_v16, %v313_v16  ;;  %v47_v19 = vmul.f32 %v315_v17, %v315_v17  ;;  %v323_v21 = vld [vmem:[#allocation2 + $0x50] sm:$0xff]  ;;  %v50_v22 = vmul.f32 %v321_v20, %v321_v20  ;;  %v329_v24 = vld [vmem:[#allocation2 + $0x68] sm:$0xff]  ;;  %v331_v25 = vld [vmem:[#allocation2 + $0x60] sm:$0xff] }
  0x18   :  { %v49_v23 = vmul.f32 %v323_v21, %v323_v21  ;;  %v52_v26 = vmul.f32 %v329_v24, %v329_v24  ;;  %v51_v27 = vmul.f32 %v331_v25, %v331_v25  ;;  %v337_v28 = vld [vmem:[#allocation2 + $0x78] sm:$0xff]  ;;  %v339_v29 = vld [vmem:[#allocation2 + $0x70] sm:$0xff]  ;;  %p233_p11 = por %p232_p10, %p231_p9 }
  0x19   :  { %v54_v30 = vmul.f32 %v337_v28, %v337_v28  ;;  %v53_v31 = vmul.f32 %v339_v29, %v339_v29 }
  0x1a   :  { %61 = vadd.xlane.f32.xlu1 %v42_v6  ;;  %57 = vadd.xlane.f32.xlu0 %v40_v7  ;;  %p234_p12 = pnand %p233_p11, %p227_p8 }
  0x1e   :  { %65 = vadd.xlane.f32.xlu1 %v44_v10  ;;  %63 = vadd.xlane.f32.xlu0 %v43_v11 }
  0x22   :  { %69 = vadd.xlane.f32.xlu1 %v46_v14  ;;  %67 = vadd.xlane.f32.xlu0 %v45_v15 }
  0x26   :  { %73 = vadd.xlane.f32.xlu1 %v48_v18  ;;  %71 = vadd.xlane.f32.xlu0 %v47_v19 }
  0x2a   :  { %77 = vadd.xlane.f32.xlu1 %v50_v22  ;;  %75 = vadd.xlane.f32.xlu0 %v49_v23 }
  0x2e   :  { %81 = vadd.xlane.f32.xlu1 %v52_v26  ;;  %79 = vadd.xlane.f32.xlu0 %v51_v27 }
  0x32   :  { %85 = vadd.xlane.f32.xlu1 %v54_v30  ;;  %83 = vadd.xlane.f32.xlu0 %v53_v31 }
  0xa3   :  { %v60_v32 = vpop.xlane.xlu1 %59  ;;  %v56_v33 = vpop.xlane.xlu0 %55 }
  0xa4   :  { %v89_v34 = vadd.f32 1e-24, %v60_v32  ;;  %v87_v35 = vadd.f32 1e-24, %v56_v33 }
  0xa6   :  { %172 = vrsqrt.f32 %v89_v34 }
  0xa7   :  { %174 = vrsqrt.f32 %v87_v35  ;;  %v62_v36 = vpop.xlane.xlu1 %61  ;;  %v58_v37 = vpop.xlane.xlu0 %57 }
  0xa8   :  { %v90_v38 = vadd.f32 1e-24, %v62_v36  ;;  %v88_v39 = vadd.f32 1e-24, %v58_v37 }
  0xaa   :  { %176 = vrsqrt.f32 %v90_v38 }
  0xab   :  { %178 = vrsqrt.f32 %v88_v39  ;;  %v66_v40 = vpop.xlane.xlu1 %65  ;;  %v64_v41 = vpop.xlane.xlu0 %63 }
  0xac   :  { %v92_v42 = vadd.f32 1e-24, %v66_v40  ;;  %v91_v43 = vadd.f32 1e-24, %v64_v41 }
  0xae   :  { %180 = vrsqrt.f32 %v92_v42 }
  0xaf   :  { %182 = vrsqrt.f32 %v91_v43  ;;  %v70_v44 = vpop.xlane.xlu1 %69  ;;  %v68_v45 = vpop.xlane.xlu0 %67 }
  0xb0   :  { %v173_v46 = vpop.eup %172  ;;  %v94_v47 = vadd.f32 1e-24, %v70_v44  ;;  %v93_v48 = vadd.f32 1e-24, %v68_v45 }
  0xb1   :  { %v175_v49 = vpop.eup %174  ;;  %v121_v50 = vmul.f32 %v173_v46, %v281_v0 }
  0xb2   :  { %v119_v51 = vmul.f32 %v175_v49, %v283_v1  ;;  %184 = vrsqrt.f32 %v94_v47 }
  0xb3   :  { %137 = vst [vmem:[#allocation5 + $0x10] sm:$0xff] %v121_v50  ;;  %186 = vrsqrt.f32 %v93_v48  ;;  %v74_v52 = vpop.xlane.xlu1 %73  ;;  %v72_v53 = vpop.xlane.xlu0 %71 }
  0xb4   :  { %v177_v54 = vpop.eup %176  ;;  %135 = vst [vmem:[#allocation5] sm:$0xff] %v119_v51  ;;  %v96_v55 = vadd.f32 1e-24, %v74_v52  ;;  %v95_v56 = vadd.f32 1e-24, %v72_v53 }
  0xb5   :  { %v179_v57 = vpop.eup %178  ;;  %v122_v58 = vmul.f32 %v177_v54, %v285_v2 }
  0xb6   :  { %v120_v59 = vmul.f32 %v179_v57, %v291_v5  ;;  %188 = vrsqrt.f32 %v96_v55 }
  0xb7   :  { %138 = vst [vmem:[#allocation5 + $0x18] sm:$0xff] %v122_v58  ;;  %190 = vrsqrt.f32 %v95_v56  ;;  %v78_v60 = vpop.xlane.xlu1 %77  ;;  %v76_v61 = vpop.xlane.xlu0 %75 }
  0xb8   :  { %v181_v62 = vpop.eup %180  ;;  %136 = vst [vmem:[#allocation5 + $0x8] sm:$0xff] %v120_v59  ;;  %v98_v63 = vadd.f32 1e-24, %v78_v60  ;;  %v97_v0 = vadd.f32 1e-24, %v76_v61 }
  0xb9   :  { %v183_v1 = vpop.eup %182  ;;  %v124_v3 = vmul.f32 %v181_v62, %v297_v8 }
  0xba   :  { %v123_v4 = vmul.f32 %v183_v1, %v299_v9  ;;  %192 = vrsqrt.f32 %v98_v63 }
  0xbb   :  { %140 = vst [vmem:[#allocation5 + $0x28] sm:$0xff] %v124_v3  ;;  %194 = vrsqrt.f32 %v97_v0  ;;  %v82_v2 = vpop.xlane.xlu1 %81  ;;  %v80_v6 = vpop.xlane.xlu0 %79 }
  0xbc   :  { %v185_v5 = vpop.eup %184  ;;  %139 = vst [vmem:[#allocation5 + $0x20] sm:$0xff] %v123_v4  ;;  %v100_v7 = vadd.f32 1e-24, %v82_v2  ;;  %v99_v10 = vadd.f32 1e-24, %v80_v6 }
  0xbd   :  { %v187_v11 = vpop.eup %186  ;;  %v126_v14 = vmul.f32 %v185_v5, %v305_v12 }
  0xbe   :  { %v125_v15 = vmul.f32 %v187_v11, %v307_v13  ;;  %196 = vrsqrt.f32 %v100_v7 }
  0xbf   :  { %142 = vst [vmem:[#allocation5 + $0x38] sm:$0xff] %v126_v14  ;;  %198 = vrsqrt.f32 %v99_v10  ;;  %v86_v8 = vpop.xlane.xlu1 %85  ;;  %v84_v18 = vpop.xlane.xlu0 %83 }
  0xc0   :  { %v189_v9 = vpop.eup %188  ;;  %141 = vst [vmem:[#allocation5 + $0x30] sm:$0xff] %v125_v15  ;;  %v102_v19 = vadd.f32 1e-24, %v86_v8  ;;  %v101_v22 = vadd.f32 1e-24, %v84_v18 }
  0xc1   :  { %v191_v23 = vpop.eup %190  ;;  %v128_v26 = vmul.f32 %v189_v9, %v313_v16 }
  0xc2   :  { %v127_v27 = vmul.f32 %v191_v23, %v315_v17  ;;  %200 = vrsqrt.f32 %v102_v19 }
  0xc3   :  { %144 = vst [vmem:[#allocation5 + $0x48] sm:$0xff] %v128_v26  ;;  %202 = vrsqrt.f32 %v101_v22 }
  0xc4   :  { %v193_v12 = vpop.eup %192  ;;  %143 = vst [vmem:[#allocation5 + $0x40] sm:$0xff] %v127_v27 }
  0xc5   :  { %v195_v13 = vpop.eup %194  ;;  %v130_v30 = vmul.f32 %v193_v12, %v321_v20 }
  0xc6   :  { %v129_v31 = vmul.f32 %v195_v13, %v323_v21 }
  0xc7   :  { %146 = vst [vmem:[#allocation5 + $0x58] sm:$0xff] %v130_v30 }
  0xc8   :  { %v197_v32 = vpop.eup %196  ;;  %145 = vst [vmem:[#allocation5 + $0x50] sm:$0xff] %v129_v31 }
  0xc9   :  { %v199_v33 = vpop.eup %198  ;;  %v132_v34 = vmul.f32 %v197_v32, %v329_v24 }
  0xca   :  { %v131_v16 = vmul.f32 %v199_v33, %v331_v25 }
  0xcb   :  { %148 = vst [vmem:[#allocation5 + $0x68] sm:$0xff] %v132_v34 }
  0xcc   :  { %v201_v17 = vpop.eup %200  ;;  %147 = vst [vmem:[#allocation5 + $0x60] sm:$0xff] %v131_v16 }
  0xcd   :  { %v203_v35 = vpop.eup %202  ;;  %v134_v36 = vmul.f32 %v201_v17, %v337_v28 }
  0xce   :  { %v133_v20 = vmul.f32 %v203_v35, %v339_v29 }
  0xcf   :  { %150 = vst [vmem:[#allocation5 + $0x78] sm:$0xff] %v134_v36 }
  0xd0   :  { %149 = vst [vmem:[#allocation5 + $0x70] sm:$0xff] %v133_v20 }
  0xd1   :  { %237 = shalt.err (!%p234_p12)
}
  0xd2   :  { %s238_s24 = scalar_lea.hbm %s377_s1, 2048 }
  0xd3   :  { %p239_p13 = scmp.ne.s32.totalorder %s377_s1, %s238_s24  ;;  %p242_p0 = scmp.lt.u32.totalorder %s238_s24, %s377_s1 }
  0xd5   :  { %p244_p1 = pnand %p242_p0, %p239_p13 }
  0xd7   :  { %247 = shalt.err (!%p244_p1)
}
  0xd8   :  { %162 = dma.vmem_to_hbm [thread:$0]  %s157_s20, 2048, %s377_s1, [#allocation4], %s253_s16, %s253_s16, %s254_s17  }
  0xd9   :  { %250 = dma.done.wait [#allocation4], 2048  }
  0xda   :  { %251 = vsyncadd [#allocation4], 4294965248 }
  0xdb   :  { %166 = vsyncpa [#allocation3], 1 }
  0xdc   :  { %167 = vsyncpa [#allocation4], 1 }

</bundles_post_ra>
